<compile_context>
chip_gen: v6e
topology: v6e:2x2x1
jax: 0.10.0
libtpu: 0.0.40
codegen_flags: <defaults>
</compile_context>

<pallas_src>
import jax
import jax.numpy as jnp
import numpy as np
from jax.experimental import pallas as pl
from jax.experimental.pallas import tpu as pltpu

# ---- module "hyper-parameters" (play the role of __init__ args) ------------
GRID_SIZE = 8
BBOX_PER_CELL = 2
NUM_CLASSES = 20
LAMBDA_COORD = 5.0
LAMBDA_NOOBJ = 0.1

FEAT_DIM = 5 * BBOX_PER_CELL + NUM_CLASSES

# Largest N-tile: 2 inputs x 2 pipeline buffers x (2048 rows x 128 lanes x 4B)
# = 4 MiB of VMEM -> comfortable headroom on every generation (incl. v7x 64MiB).
TILE_N_MAX = 2048
NUM_PARTIALS = 2          # leading "parallel" grid axis (2 TensorCores on v7x)


def _round_up(x, m):
    return ((x + m - 1) // m) * m


def _weight_rows_np():
    """Static per-column weight rows selected per-cell inside the kernel.

    row 0                : 1.0 at conf cols + class cols        (gate: any_obj)
    row 1 + a            : lambda_coord at coord cols of anchor a (gate: t_conf_a > 0)
    row 1 + Bc + a       : lambda_noobj at conf col of anchor a   (gate: t_conf_a == 0)
    """
    rows = np.zeros((2 * BBOX_PER_CELL + 1, FEAT_DIM), np.float32)
    for a in range(BBOX_PER_CELL):
        rows[0, 5 * a + 4] = 1.0
        rows[1 + a, 5 * a:5 * a + 4] = LAMBDA_COORD
        rows[1 + BBOX_PER_CELL + a, 5 * a + 4] = LAMBDA_NOOBJ
    rows[0, 5 * BBOX_PER_CELL:] = 1.0
    return rows


def yolo_loss_kernel(pred_ref, targ_ref, wrow_ref, out_ref):
    """pred/targ: (tile_n, D) blocks.  wrow: (2*Bc+1, D) resident constants.
    out_ref: (1, 1, D) resident accumulator holding per-column partial sums."""
    step = pl.program_id(1)

    @pl.when(step == 0)
    def _init():
        out_ref[...] = jnp.zeros_like(out_ref)

    pred = pred_ref[...].astype(jnp.float32)            # (tile_n, D)
    targ = targ_ref[...].astype(jnp.float32)            # (tile_n, D)
    diff = pred - targ
    d2 = diff * diff

    # Per-anchor target confidences -> masks (narrow (tile_n, 1) slices).
    confs = [targ[:, 5 * a + 4:5 * a + 5] for a in range(BBOX_PER_CELL)]
    has_obj = [c > 0.0 for c in confs]
    any_obj = has_obj[0]
    for h in has_obj[1:]:
        any_obj = jnp.logical_or(any_obj, h)

    # Fused (tile_n, D) weight tensor via broadcasted selects of the static
    # per-column weight rows.  No per-term reductions, no concatenates.
    w = jnp.where(any_obj, wrow_ref[0:1, :], 0.0)
    for a in range(BBOX_PER_CELL):
        w = w + jnp.where(has_obj[a], wrow_ref[1 + a:2 + a, :], 0.0)
        w = w + jnp.where(confs[a] == 0.0,
                          wrow_ref[1 + BBOX_PER_CELL + a:
                                   2 + BBOX_PER_CELL + a, :],
                          0.0)

    wd = w * d2                                          # (tile_n, D)

    # Reduce the tile's rows on the (otherwise idle) MXU: ones-row @ wd keeps
    # the XLU out of the loop; accumulate per-feature-column partial sums.
    ones_row = jnp.ones((1, wd.shape[0]), jnp.float32)
    colsum = jnp.dot(ones_row, wd, preferred_element_type=jnp.float32)  # (1, D)
    out_ref[...] += colsum.reshape(1, 1, wd.shape[1])


def yolo_loss(predictions, targets):
    """predictions/targets: (B, S, S, 5*Bc + nc).  Returns scalar f32 loss."""
    b, s, s2, d = predictions.shape
    assert s == GRID_SIZE and s2 == GRID_SIZE and d == FEAT_DIM
    assert targets.shape == predictions.shape
    n = b * s * s

    # Keep the caller's dtype (bf16 transport halves HBM traffic on v5e);
    # the kernel casts to f32 after the DMA.
    pred2 = predictions.reshape(n, d)
    targ2 = targets.reshape(n, d)

    # --- tiling: minimize zero padding while keeping tiles <= TILE_N_MAX ----
    max_tiles = -(-n // TILE_N_MAX)
    num_parts = NUM_PARTIALS if max_tiles >= NUM_PARTIALS else 1
    n_tiles = _round_up(max_tiles, num_parts)
    tile_n = min(TILE_N_MAX, _round_up(-(-n // n_tiles), 16))
    inner = n_tiles // num_parts
    n_pad = n_tiles * tile_n
    if n_pad != n:
        # Zero rows are loss-neutral: t_conf == 0 there and pred == targ == 0.
        pred2 = jnp.pad(pred2, ((0, n_pad - n), (0, 0)))
        targ2 = jnp.pad(targ2, ((0, n_pad - n), (0, 0)))

    wrow = jnp.asarray(_weight_rows_np())                # (2*Bc + 1, D) f32

    data_spec = pl.BlockSpec((tile_n, d), lambda p, i: (p * inner + i, 0))
    partials = pl.pallas_call(
        yolo_loss_kernel,
        out_shape=jax.ShapeDtypeStruct((num_parts, 1, d), jnp.float32),
        grid=(num_parts, inner),
        in_specs=[
            data_spec,
            data_spec,
            pl.BlockSpec((2 * BBOX_PER_CELL + 1, d), lambda p, i: (0, 0)),
        ],
        out_specs=pl.BlockSpec((1, 1, d), lambda p, i: (p, 0, 0)),
        compiler_params=pltpu.CompilerParams(
            dimension_semantics=("parallel", "arbitrary")),
    )(pred2, targ2, wrow)

    # Tiny final reduce over (num_parts, 1, D) partial column sums.
    return jnp.sum(partials)


# ----------------------------- pure-JAX reference ---------------------------
def yolo_loss_ref(pred, targ):
    b, s, _, d = pred.shape
    bc, nc = BBOX_PER_CELL, NUM_CLASSES
    pb = pred[..., :5 * bc].reshape(b, s, s, bc, 5)
    pc = pred[..., 5 * bc:]
    tb = targ[..., :5 * bc].reshape(b, s, s, bc, 5)
    tc = targ[..., 5 * bc:]

    coord_mask = (tb[..., 4] > 0)[..., None]
    coord_loss = jnp.sum(jnp.where(coord_mask,
                                   (pb[..., :4] - tb[..., :4]) ** 2, 0.0))
    obj_mask = jnp.any(tb[..., 4] > 0, axis=-1)
    noobj_mask = tb[..., 4] == 0
    conf_d2 = (pb[..., 4] - tb[..., 4]) ** 2
    obj_conf_loss = jnp.sum(jnp.where(obj_mask[..., None], conf_d2, 0.0))
    noobj_conf_loss = jnp.sum(jnp.where(noobj_mask, conf_d2, 0.0))
    class_loss = jnp.sum(jnp.where(obj_mask[..., None], (pc - tc) ** 2, 0.0))
    return (LAMBDA_COORD * coord_loss + obj_conf_loss
            + LAMBDA_NOOBJ * noobj_conf_loss + class_loss)


if __name__ == "__main__":
    key = jax.random.PRNGKey(0)
    k1, k2, k3, k4 = jax.random.split(key, 4)

    B, S, Bc, nc = 2, GRID_SIZE, BBOX_PER_CELL, NUM_CLASSES
    D = 5 * Bc + nc

    # deterministic synthetic inputs
    predictions = jax.random.normal(k1, (B, S, S, D), dtype=jnp.float32)

    coords = jax.random.uniform(k2, (B, S, S, Bc, 4), dtype=jnp.float32)
    conf = (jax.random.uniform(k3, (B, S, S, Bc)) > 0.6).astype(jnp.float32)
    boxes = jnp.concatenate([coords, conf[..., None]], axis=-1)  # (B,S,S,Bc,5)
    boxes = boxes.reshape(B, S, S, 5 * Bc)
    cls_idx = jax.random.randint(k4, (B, S, S), 0, nc)
    cls_onehot = jax.nn.one_hot(cls_idx, nc, dtype=jnp.float32)
    targets = jnp.concatenate([boxes, cls_onehot], axis=-1)      # (B,S,S,D)

    loss = jax.block_until_ready(yolo_loss(predictions, targets))
    loss_ref = jax.block_until_ready(yolo_loss_ref(predictions, targets))

    np.testing.assert_allclose(np.asarray(loss), np.asarray(loss_ref),
                               rtol=1e-5, atol=1e-2)
    print("KERNEL_OK")
</pallas_src>

<mosaic_0001>
module attributes {stable_mosaic.version = 11 : i64} {
  func.func @yolo_loss_kernel(%arg0: i32, %arg1: i32, %arg2: memref<128x30xf32, #tpu.memory_space<vmem>>, %arg3: memref<128x30xf32, #tpu.memory_space<vmem>>, %arg4: memref<5x30xf32, #tpu.memory_space<vmem>>, %arg5: memref<1x1x30xf32, #tpu.memory_space<vmem>>) attributes {dimension_semantics = [#tpu.dimension_semantics<parallel>, #tpu.dimension_semantics<arbitrary>], iteration_bounds = array<i64: 1, 1>, scalar_prefetch = 0 : i64, scratch_operands = 0 : i64, tpu.core_type = #tpu.core_type<tc>, window_params = [{transform_indices = @transform_0, window_bounds = array<i64: 128, 30>}, {transform_indices = @transform_1, window_bounds = array<i64: 128, 30>}, {pipeline_mode = #tpu.pipeline_mode<synchronous>, transform_indices = @transform_2, window_bounds = array<i64: 5, 30>}, {transform_indices = @transform_3, window_bounds = array<i64: 1, 1, 30>}]} {
    %c0_i32 = arith.constant 0 : i32
    %0 = arith.cmpi eq, %arg1, %c0_i32 : i32
    %1 = arith.extui %0 : i1 to i32
    %c0_i32_0 = arith.constant 0 : i32
    %2 = arith.cmpi ne, %1, %c0_i32_0 : i32
    scf.if %2 {
      %cst_26 = arith.constant 0.000000e+00 : f32
      %64 = vector.broadcast %cst_26 : f32 to vector<1x1x30xf32>
      %c0_27 = arith.constant 0 : index
      %c0_28 = arith.constant 0 : index
      %c0_29 = arith.constant 0 : index
      %65 = vector.load %arg5[%c0_27, %c0_28, %c0_29] : memref<1x1x30xf32, #tpu.memory_space<vmem>>, vector<1x1x30xf32>
      tpu.vector_store %arg5[%c0_27, %c0_28, %c0_29], %64 {strides = array<i32>} : memref<1x1x30xf32, #tpu.memory_space<vmem>>, vector<1x1x30xf32>,
    } else {
    }
    %c0 = arith.constant 0 : index
    %c0_1 = arith.constant 0 : index
    %3 = vector.load %arg2[%c0, %c0_1] : memref<128x30xf32, #tpu.memory_space<vmem>>, vector<128x30xf32>
    %c0_2 = arith.constant 0 : index
    %c0_3 = arith.constant 0 : index
    %4 = vector.load %arg3[%c0_2, %c0_3] : memref<128x30xf32, #tpu.memory_space<vmem>>, vector<128x30xf32>
    %5 = arith.subf %3, %4 : vector<128x30xf32>
    %6 = arith.mulf %5, %5 : vector<128x30xf32>
    %7 = vector.extract_strided_slice %4 {offsets = [0, 4], sizes = [128, 1], strides = [1, 1]} : vector<128x30xf32> to vector<128x1xf32>
    %8 = vector.extract_strided_slice %4 {offsets = [0, 9], sizes = [128, 1], strides = [1, 1]} : vector<128x30xf32> to vector<128x1xf32>
    %cst = arith.constant 0.000000e+00 : f32
    %9 = vector.broadcast %cst : f32 to vector<128x1xf32>
    %10 = arith.cmpf ogt, %7, %9 : vector<128x1xf32>
    %cst_4 = arith.constant 0.000000e+00 : f32
    %11 = vector.broadcast %cst_4 : f32 to vector<128x1xf32>
    %12 = arith.cmpf ogt, %8, %11 : vector<128x1xf32>
    %13 = arith.ori %10, %12 : vector<128x1xi1>
    %c0_5 = arith.constant 0 : index
    %c0_6 = arith.constant 0 : index
    %14 = vector.load %arg4[%c0_5, %c0_6] : memref<5x30xf32, #tpu.memory_space<vmem>>, vector<1x30xf32>
    %cst_7 = arith.constant 0.000000e+00 : f32
    %15 = vector.shape_cast %13 : vector<128x1xi1> to vector<128x1xi1>
    %16 = vector.broadcast %15 : vector<128x1xi1> to vector<128x30xi1>
    %17 = vector.shape_cast %14 : vector<1x30xf32> to vector<1x30xf32>
    %18 = vector.broadcast %17 : vector<1x30xf32> to vector<128x30xf32>
    %19 = vector.broadcast %cst_7 : f32 to vector<128x30xf32>
    %20 = arith.select %16, %18, %19 : vector<128x30xi1>, vector<128x30xf32>
    %c1 = arith.constant 1 : index
    %c0_8 = arith.constant 0 : index
    %21 = vector.load %arg4[%c1, %c0_8] : memref<5x30xf32, #tpu.memory_space<vmem>>, vector<1x30xf32>
    %cst_9 = arith.constant 0.000000e+00 : f32
    %22 = vector.shape_cast %10 : vector<128x1xi1> to vector<128x1xi1>
    %23 = vector.broadcast %22 : vector<128x1xi1> to vector<128x30xi1>
    %24 = vector.shape_cast %21 : vector<1x30xf32> to vector<1x30xf32>
    %25 = vector.broadcast %24 : vector<1x30xf32> to vector<128x30xf32>
    %26 = vector.broadcast %cst_9 : f32 to vector<128x30xf32>
    %27 = arith.select %23, %25, %26 : vector<128x30xi1>, vector<128x30xf32>
    %28 = arith.addf %20, %27 : vector<128x30xf32>
    %cst_10 = arith.constant 0.000000e+00 : f32
    %29 = vector.broadcast %cst_10 : f32 to vector<128x1xf32>
    %30 = arith.cmpf oeq, %7, %29 : vector<128x1xf32>
    %c3 = arith.constant 3 : index
    %c0_11 = arith.constant 0 : index
    %31 = vector.load %arg4[%c3, %c0_11] : memref<5x30xf32, #tpu.memory_space<vmem>>, vector<1x30xf32>
    %cst_12 = arith.constant 0.000000e+00 : f32
    %32 = vector.shape_cast %30 : vector<128x1xi1> to vector<128x1xi1>
    %33 = vector.broadcast %32 : vector<128x1xi1> to vector<128x30xi1>
    %34 = vector.shape_cast %31 : vector<1x30xf32> to vector<1x30xf32>
    %35 = vector.broadcast %34 : vector<1x30xf32> to vector<128x30xf32>
    %36 = vector.broadcast %cst_12 : f32 to vector<128x30xf32>
    %37 = arith.select %33, %35, %36 : vector<128x30xi1>, vector<128x30xf32>
    %38 = arith.addf %28, %37 : vector<128x30xf32>
    %c2 = arith.constant 2 : index
    %c0_13 = arith.constant 0 : index
    %39 = vector.load %arg4[%c2, %c0_13] : memref<5x30xf32, #tpu.memory_space<vmem>>, vector<1x30xf32>
    %cst_14 = arith.constant 0.000000e+00 : f32
    %40 = vector.shape_cast %12 : vector<128x1xi1> to vector<128x1xi1>
    %41 = vector.broadcast %40 : vector<128x1xi1> to vector<128x30xi1>
    %42 = vector.shape_cast %39 : vector<1x30xf32> to vector<1x30xf32>
    %43 = vector.broadcast %42 : vector<1x30xf32> to vector<128x30xf32>
    %44 = vector.broadcast %cst_14 : f32 to vector<128x30xf32>
    %45 = arith.select %41, %43, %44 : vector<128x30xi1>, vector<128x30xf32>
    %46 = arith.addf %38, %45 : vector<128x30xf32>
    %cst_15 = arith.constant 0.000000e+00 : f32
    %47 = vector.broadcast %cst_15 : f32 to vector<128x1xf32>
    %48 = arith.cmpf oeq, %8, %47 : vector<128x1xf32>
    %c4 = arith.constant 4 : index
    %c0_16 = arith.constant 0 : index
    %49 = vector.load %arg4[%c4, %c0_16] : memref<5x30xf32, #tpu.memory_space<vmem>>, vector<1x30xf32>
    %cst_17 = arith.constant 0.000000e+00 : f32
    %50 = vector.shape_cast %48 : vector<128x1xi1> to vector<128x1xi1>
    %51 = vector.broadcast %50 : vector<128x1xi1> to vector<128x30xi1>
    %52 = vector.shape_cast %49 : vector<1x30xf32> to vector<1x30xf32>
    %53 = vector.broadcast %52 : vector<1x30xf32> to vector<128x30xf32>
    %54 = vector.broadcast %cst_17 : f32 to vector<128x30xf32>
    %55 = arith.select %51, %53, %54 : vector<128x30xi1>, vector<128x30xf32>
    %56 = arith.addf %46, %55 : vector<128x30xf32>
    %57 = arith.mulf %56, %6 : vector<128x30xf32>
    %cst_18 = arith.constant 1.000000e+00 : f32
    %58 = vector.broadcast %cst_18 : f32 to vector<1x128xf32>
    %cst_19 = arith.constant dense<0.000000e+00> : vector<1x30xf32>
    %59 = tpu.matmul %58, %57, %cst_19 {dimension_numbers = #tpu.dot_dimension_numbers<[1], [0], [0], [1], [0, 0, 1, 1], [], []>} : vector<1x128xf32>, vector<128x30xf32>, vector<1x30xf32> -> vector<1x30xf32>
    %c0_20 = arith.constant 0 : index
    %c0_21 = arith.constant 0 : index
    %c0_22 = arith.constant 0 : index
    %60 = vector.load %arg5[%c0_20, %c0_21, %c0_22] : memref<1x1x30xf32, #tpu.memory_space<vmem>>, vector<1x1x30xf32>
    %61 = vector.shape_cast %59 : vector<1x30xf32> to vector<1x1x30xf32>
    %62 = arith.addf %60, %61 : vector<1x1x30xf32>
    %c0_23 = arith.constant 0 : index
    %c0_24 = arith.constant 0 : index
    %c0_25 = arith.constant 0 : index
    %63 = vector.load %arg5[%c0_23, %c0_24, %c0_25] : memref<1x1x30xf32, #tpu.memory_space<vmem>>, vector<1x1x30xf32>
    tpu.vector_store %arg5[%c0_23, %c0_24, %c0_25], %62 {strides = array<i32>} : memref<1x1x30xf32, #tpu.memory_space<vmem>>, vector<1x1x30xf32>,
    return
  }
  func.func @transform_0(%arg0: i32, %arg1: i32) -> (i32, i32) {
    %c1_i32 = arith.constant 1 : i32
    %0 = arith.muli %arg0, %c1_i32 : i32
    %1 = arith.addi %0, %arg1 : i32
    %c0_i32 = arith.constant 0 : i32
    %c0_i32_0 = arith.constant 0 : i32
    return %1, %c0_i32 : i32, i32
  }
  func.func @transform_1(%arg0: i32, %arg1: i32) -> (i32, i32) {
    %c1_i32 = arith.constant 1 : i32
    %0 = arith.muli %arg0, %c1_i32 : i32
    %1 = arith.addi %0, %arg1 : i32
    %c0_i32 = arith.constant 0 : i32
    %c0_i32_0 = arith.constant 0 : i32
    return %1, %c0_i32 : i32, i32
  }
  func.func @transform_2(%arg0: i32, %arg1: i32) -> (i32, i32) {
    %c0_i32 = arith.constant 0 : i32
    %c0_i32_0 = arith.constant 0 : i32
    %c0_i32_1 = arith.constant 0 : i32
    return %c0_i32, %c0_i32_0 : i32, i32
  }
  func.func @transform_3(%arg0: i32, %arg1: i32) -> (i32, i32, i32) {
    %c0_i32 = arith.constant 0 : i32
    %c0_i32_0 = arith.constant 0 : i32
    %c0_i32_1 = arith.constant 0 : i32
    return %arg0, %c0_i32, %c0_i32_0 : i32, i32, i32
  }
}

</mosaic_0001>

<bundles_post_ra>
// kernel: tpu_custom_call.1
= control target key start
LH: loop header
LB: loop body
LE: loop exit
PB: predicated region body
PF: predicated region fallthrough
CT: control target
= control target key end

     0   :  { %v999_v4 = vmov 4   ;;  %v1000_v5 = vmov 0   ;;  %s1001_s24 = smov 123   ;;  %s1794_s0 = inlined_call_operand.vmem [shape: f32[128,30], index: 0, kind: input, shape index: {}]   ;;  %s1795_s1 = inlined_call_operand.vmem [shape: f32[128,30], index: 1, kind: input, shape index: {}]   ;;  %s1796_s2 = inlined_call_operand.vmem [shape: f32[5,30], index: 2, kind: input, shape index: {}]   ;;  %s1797_s3 = inlined_call_operand.hbm [shape: f32[1,1,30], index: 3, kind: output, shape index: {}]  }
   0x1   :  { %v1030_v0 = vld [vmem:[%s1795_s1 + $0x78] sm:$0xff]  ;;  %v1035_v1 = vld [vmem:[%s1795_s1 + $0x68] sm:$0xff]  ;;  %v1040_v2 = vld [vmem:[%s1795_s1 + $0x70] sm:$0xff]  ;;  %943 = vset.pattern.permute.xlu1 %v999_v4  ;;  %944 = vset.pattern.permute.xlu0 %v999_v4 }
   0x2   :  { %vm144_vm0 = vcmp.gt.f32.partialorder %v1030_v0, 0.0  ;;  %vm142_vm1 = vcmp.gt.f32.partialorder %v1035_v1, 0.0  ;;  %vm1806_vm2 = vcmp.gt.f32.partialorder %v1040_v2, 0.0  ;;  %v1048_v3 = vld [vmem:[%s1795_s1 + $0x60] sm:$0xff]  ;;  %v1066_v8 = vld [vmem:[%s1795_s1 + $0x58] sm:$0xff]  ;;  %v1071_v9 = vld [vmem:[%s1795_s1 + $0x50] sm:$0xff] }
   0x3   :  { %v1055_v6 = vsel %vm144_vm0, 1, %v1000_v5  ;;  %v1060_v7 = vsel %vm142_vm1, 1, %v1000_v5  ;;  %vm1805_vm3 = vcmp.gt.f32.partialorder %v1048_v3, 0.0  ;;  %v1080_v10 = vsel %vm1806_vm2, 1, %v1000_v5  ;;  %v1092_v12 = vld [vmem:[%s1795_s1 + $0x48] sm:$0xff]  ;;  %v1097_v13 = vld [vmem:[%s1795_s1 + $0x40] sm:$0xff] }
   0x4   :  { %191 = vrot.lane.b32.xlu0 %v1055_v6, %s1001_s24  ;;  %187 = vrot.lane.b32.xlu1 %v1060_v7, %s1001_s24  ;;  %v1085_v11 = vsel %vm1805_vm3, 1, %v1000_v5  ;;  %vm1804_vm4 = vcmp.gt.f32.partialorder %v1066_v8, 0.0  ;;  %vm1803_vm5 = vcmp.gt.f32.partialorder %v1071_v9, 0.0 }
   0x8   :  { %189 = vrot.lane.b32.xlu0 %v1080_v10, %s1001_s24  ;;  %185 = vrot.lane.b32.xlu1 %v1085_v11, %s1001_s24 }
   0x9   :  { %8 = vsyncpa [#allocation3], 0  ;;  %v1106_v14 = vsel %vm1804_vm4, 1, %v1000_v5  ;;  %v1111_v15 = vsel %vm1803_vm5, 1, %v1000_v5  ;;  %vm1802_vm6 = vcmp.gt.f32.partialorder %v1092_v12, 0.0  ;;  %vm1801_vm7 = vcmp.gt.f32.partialorder %v1097_v13, 0.0 }
   0xa   :  { %v1118_v16 = vld [vmem:[%s1795_s1 + $0x38] sm:$0xff]  ;;  %v1123_v17 = vld [vmem:[%s1795_s1 + $0x30] sm:$0xff]  ;;  %v1132_v18 = vsel %vm1802_vm6, 1, %v1000_v5  ;;  %v1137_v19 = vsel %vm1801_vm7, 1, %v1000_v5  ;;  %v1144_v20 = vld [vmem:[%s1795_s1 + $0x28] sm:$0xff]  ;;  %vm439_vm7 = vcmp.eq.f32.partialorder %v1048_v3, 0.0 }
   0xb   :  { %vm1800_vm8 = vcmp.gt.f32.partialorder %v1118_v16, 0.0  ;;  %vm1799_vm9 = vcmp.gt.f32.partialorder %v1123_v17, 0.0  ;;  %v1149_v21 = vld [vmem:[%s1795_s1 + $0x20] sm:$0xff]  ;;  %vm1798_vm10 = vcmp.gt.f32.partialorder %v1144_v20, 0.0  ;;  %v1170_v24 = vld [vmem:[%s1795_s1 + $0x18] sm:$0xff]  ;;  %v1175_v25 = vld [vmem:[%s1795_s1 + $0x10] sm:$0xff] }
   0xc   :  { %183 = vrot.lane.b32.xlu0 %v1106_v14, %s1001_s24  ;;  %181 = vrot.lane.b32.xlu1 %v1111_v15, %s1001_s24  ;;  %v1158_v22 = vsel %vm1800_vm8, 1, %v1000_v5  ;;  %v1163_v23 = vsel %vm1799_vm9, 1, %v1000_v5  ;;  %vm133_vm11 = vcmp.gt.f32.partialorder %v1149_v21, 0.0  ;;  %v1184_v26 = vsel %vm1798_vm10, 1, %v1000_v5  ;;  %v1196_v28 = vld [vmem:[%s1795_s1 + $0x8] sm:$0xff]  ;;  %v1201_v29 = vld [vmem:[%s1795_s1] sm:$0xff] }
   0xd   :  { %v1189_v27 = vsel %vm133_vm11, 1, %v1000_v5  ;;  %vm132_vm12 = vcmp.gt.f32.partialorder %v1170_v24, 0.0  ;;  %vm131_vm13 = vcmp.gt.f32.partialorder %v1175_v25, 0.0  ;;  %vm130_vm14 = vcmp.gt.f32.partialorder %v1196_v28, 0.0 }
   0xe   :  { %v1210_v30 = vsel %vm132_vm12, 1, %v1000_v5  ;;  %v1215_v31 = vsel %vm131_vm13, 1, %v1000_v5  ;;  %vm129_vm15 = vcmp.gt.f32.partialorder %v1201_v29, 0.0  ;;  %v1226_v32 = vsel %vm130_vm14, 1, %v1000_v5 }
   0xf   :  { %v1231_v33 = vsel %vm129_vm15, 1, %v1000_v5  ;;  %vm442_vm10 = vcmp.eq.f32.partialorder %v1030_v0, 0.0  ;;  %vm441_vm9 = vcmp.eq.f32.partialorder %v1040_v2, 0.0  ;;  %vm440_vm8 = vcmp.eq.f32.partialorder %v1035_v1, 0.0 }
  0x10   :  { %179 = vrot.lane.b32.xlu0 %v1132_v18, %s1001_s24  ;;  %177 = vrot.lane.b32.xlu1 %v1137_v19, %s1001_s24  ;;  %v459_v34 = vsel %vm442_vm10, 1, %v1000_v5  ;;  %v1245_v35 = vsel %vm441_vm9, 1, %v1000_v5  ;;  %v457_v36 = vsel %vm440_vm8, 1, %v1000_v5  ;;  %v1251_v37 = vsel %vm439_vm7, 1, %v1000_v5 }
  0x11   :  { %vm438_vm10 = vcmp.eq.f32.partialorder %v1066_v8, 0.0  ;;  %vm437_vm9 = vcmp.eq.f32.partialorder %v1071_v9, 0.0  ;;  %v1002_v39 = vmov 9   ;;  %vm436_vm7 = vcmp.eq.f32.partialorder %v1092_v12, 0.0 }
  0x12   :  { %v455_v38 = vsel %vm438_vm10, 1, %v1000_v5  ;;  %v1261_v40 = vsel %vm437_vm9, 1, %v1000_v5  ;;  %v1266_v41 = vsel %vm436_vm7, 1, %v1000_v5 }
  0x14   :  { %175 = vrot.lane.b32.xlu0 %v1158_v22, %s1001_s24  ;;  %173 = vrot.lane.b32.xlu1 %v1163_v23, %s1001_s24 }
  0x18   :  { %171 = vrot.lane.b32.xlu0 %v1184_v26, %s1001_s24  ;;  %169 = vrot.lane.b32.xlu1 %v1189_v27, %s1001_s24 }
  0x1c   :  { %167 = vrot.lane.b32.xlu0 %v1210_v30, %s1001_s24  ;;  %165 = vrot.lane.b32.xlu1 %v1215_v31, %s1001_s24 }
  0x20   :  { %163 = vrot.lane.b32.xlu0 %v1226_v32, %s1001_s24  ;;  %161 = vrot.lane.b32.xlu1 %v1231_v33, %s1001_s24 }
  0x24   :  { %373 = vperm.xlu1 %943, %v1055_v6   ;;  %506 = vperm.xlu0 %944, %v459_v34  }
  0x28   :  { %370 = vperm.xlu1 %943, %v1080_v10   ;;  %367 = vperm.xlu0 %944, %v1060_v7  }
  0x2c   :  { %503 = vperm.xlu1 %943, %v1245_v35   ;;  %500 = vperm.xlu0 %944, %v457_v36  }
  0x30   :  { %364 = vperm.xlu1 %943, %v1085_v11   ;;  %497 = vperm.xlu0 %944, %v1251_v37  }
  0x34   :  { %945 = vset.pattern.permute.xlu1 %v1002_v39  ;;  %494 = vperm.xlu0 %944, %v455_v38  }
  0x35   :  { %604 = vperm.xlu1 %945, %v1080_v10  }
  0x38   :  { %491 = vperm.xlu0 %944, %v1261_v40  }
  0x39   :  { %708 = vperm.xlu1 %945, %v459_v34  }
  0x3c   :  { %488 = vperm.xlu0 %944, %v1266_v41  }
  0x3d   :  { %946 = vset.pattern.permute.xlu1 %v999_v4 }
  0x3e   :  { %361 = vperm.xlu1 %946, %v1106_v14  }
  0x42   :  { %947 = vset.pattern.permute.xlu1 %v1002_v39 }
  0x43   :  { %601 = vperm.xlu1 %947, %v1060_v7  }
  0x47   :  { %948 = vset.pattern.permute.xlu1 %v999_v4 }
  0x48   :  { %358 = vperm.xlu1 %948, %v1111_v15  }
  0x4c   :  { %949 = vset.pattern.permute.xlu1 %v1002_v39 }
  0x4d   :  { %598 = vperm.xlu1 %949, %v1085_v11  }
  0x51   :  { %702 = vperm.xlu1 %949, %v457_v36  }
  0x55   :  { %950 = vset.pattern.permute.xlu1 %v999_v4 }
  0x56   :  { %355 = vperm.xlu1 %950, %v1132_v18  }
  0x5a   :  { %951 = vset.pattern.permute.xlu1 %v1002_v39 }
  0x5b   :  { %595 = vperm.xlu1 %951, %v1106_v14  }
  0x5f   :  { %952 = vset.pattern.permute.xlu1 %v999_v4 }
  0x60   :  { %352 = vperm.xlu1 %952, %v1137_v19  }
  0x64   :  { %953 = vset.pattern.permute.xlu1 %v1002_v39 }
  0x65   :  { %592 = vperm.xlu1 %953, %v1111_v15  }
  0x69   :  { %696 = vperm.xlu1 %953, %v455_v38  }
  0x6d   :  { %954 = vset.pattern.permute.xlu1 %v999_v4 }
  0x76   :  { %v192_v42 = vpop.permute.xlu0 %191  ;;  %v188_v43 = vpop.permute.xlu1 %187 }
  0x7a   :  { %v190_v44 = vpop.permute.xlu0 %189  ;;  %v186_v45 = vpop.permute.xlu1 %185 }
  0x7e   :  { %v184_v46 = vpop.permute.xlu0 %183  ;;  %v182_v47 = vpop.permute.xlu1 %181 }
  0x82   :  { %v180_v48 = vpop.permute.xlu0 %179  ;;  %v178_v49 = vpop.permute.xlu1 %177 }
  0x86   :  { %v1286_v50 = vpop.permute.xlu0 %175  ;;  %v1288_v51 = vpop.permute.xlu1 %173 }
  0x8a   :  { %v1290_v52 = vpop.permute.xlu0 %171  ;;  %v170_v53 = vpop.permute.xlu1 %169 }
  0x8b   :  { %vm197_vm3 = vcmp.ne.s32.totalorder %v170_v53, 0 }
  0x8e   :  { %v168_v54 = vpop.permute.xlu0 %167  ;;  %v166_v55 = vpop.permute.xlu1 %165 }
  0x8f   :  { %vm195_vm8 = vcmp.ne.s32.totalorder %v166_v55, 0  ;;  %vm196_vm6 = vcmp.ne.s32.totalorder %v168_v54, 0 }
  0x90   :  { %vm211_vm7 = vmor %vm131_vm13, %vm195_vm8  ;;  %vm208_vm13 = vcmp.ne.s32.totalorder %v192_v42, 0  ;;  %vm205_vm8 = vcmp.ne.s32.totalorder %v186_v45, 0 }
  0x91   :  { %vm212_vm2 = vmor %vm132_vm12, %vm196_vm6  ;;  %v228_v60 = vsel %vm211_vm7, 1, %v1000_v5  ;;  %vm1807_vm12 = vcmp.gt.f32.partialorder %v1040_v2, 0.0  ;;  %vm203_vm7 = vcmp.ne.s32.totalorder %v182_v47, 0 }
  0x92   :  { %v164_v56 = vpop.permute.xlu0 %163  ;;  %v162_v57 = vpop.permute.xlu1 %161  ;;  %v229_v61 = vsel %vm212_vm2, 1, %v1000_v5 }
  0x93   :  { %vm194_vm10 = vcmp.ne.s32.totalorder %v164_v56, 0  ;;  %vm193_vm9 = vcmp.ne.s32.totalorder %v162_v57, 0 }
  0x94   :  { %vm210_vm5 = vmor %vm130_vm14, %vm194_vm10  ;;  %vm1809_vm10 = vcmp.gt.f32.partialorder %v1066_v8, 0.0 }
  0x95   :  { %vm209_vm4 = vmor %vm129_vm15, %vm193_vm9  ;;  %v227_v58 = vsel %vm210_vm5, 1, %v1000_v5  ;;  %vm206_vm15 = vcmp.ne.s32.totalorder %v188_v43, 0 }
  0x96   :  { %246 = vperm.xlu1 %954, %v227_v58   ;;  %v226_v59 = vsel %vm209_vm4, 1, %v1000_v5  ;;  %vm213_vm14 = vmor %vm133_vm11, %vm197_vm3  ;;  %vm207_vm4 = vcmp.ne.s32.totalorder %v190_v44, 0  ;;  %vm204_vm3 = vcmp.ne.s32.totalorder %v184_v46, 0 }
  0x97   :  { %243 = vperm.xlu0 %944, %v226_v59   ;;  %vm224_vm5 = vmor %vm144_vm0, %vm208_vm13  ;;  %v230_v62 = vsel %vm213_vm14, 1, %v1000_v5  ;;  %vm1808_vm0 = vcmp.gt.f32.partialorder %v1048_v3, 0.0  ;;  %vm1810_vm13 = vcmp.gt.f32.partialorder %v1071_v9, 0.0 }
  0x98   :  { %v241_v63 = vsel %vm224_vm5, 1, %v1000_v5  ;;  %vm222_vm6 = vmor %vm142_vm1, %vm206_vm15  ;;  %vm202_vm1 = vcmp.ne.s32.totalorder %v180_v48, 0  ;;  %vm1811_vm5 = vcmp.gt.f32.partialorder %v1092_v12, 0.0 }
  0x99   :  { %vm223_vm2 = vmor %vm1807_vm12, %vm207_vm4  ;;  %v239_v7 = vsel %vm222_vm6, 1, %v1000_v5  ;;  %vm201_vm4 = vcmp.ne.s32.totalorder %v178_v49, 0  ;;  %vm435_vm6 = vcmp.eq.f32.partialorder %v1097_v13, 0.0  ;;  %vm1812_vm12 = vcmp.gt.f32.partialorder %v1097_v13, 0.0 }
  0x9a   :  { %249 = vperm.xlu1 %954, %v228_v60   ;;  %v240_v10 = vsel %vm223_vm2, 1, %v1000_v5  ;;  %vm221_vm11 = vmor %vm1808_vm0, %vm205_vm8  ;;  %vm200_vm8 = vcmp.ne.s32.totalorder %v1286_v50, 0  ;;  %v452_v36 = vsel %vm435_vm6, 1, %v1000_v5  ;;  %vm431_vm6 = vcmp.eq.f32.partialorder %v1149_v21, 0.0 }
  0x9b   :  { %252 = vperm.xlu0 %944, %v229_v61   ;;  %vm220_vm9 = vmor %vm1809_vm10, %vm204_vm3  ;;  %v238_v11 = vsel %vm221_vm11, 1, %v1000_v5  ;;  %vm1813_vm3 = vcmp.gt.f32.partialorder %v1118_v16, 0.0  ;;  %vm434_vm11 = vcmp.eq.f32.partialorder %v1118_v16, 0.0  ;;  %vm199_vm10 = vcmp.ne.s32.totalorder %v1288_v51, 0  ;;  %v1464_v61 = vld [vmem:[%s1796_s2 + $0x1] ss:$0 sm:$0xff] }
  0x9c   :  { %v237_v14 = vsel %vm220_vm9, 1, %v1000_v5  ;;  %vm219_vm14 = vmor %vm1810_vm13, %vm203_vm7  ;;  %v451_v43 = vsel %vm434_vm11, 1, %v1000_v5  ;;  %vm433_vm9 = vcmp.eq.f32.partialorder %v1123_v17, 0.0  ;;  %vm198_vm7 = vcmp.ne.s32.totalorder %v1290_v52, 0 }
  0x9d   :  { %vm218_vm15 = vmor %vm1811_vm5, %vm202_vm1  ;;  %v236_v15 = vsel %vm219_vm14, 1, %v1000_v5  ;;  %v450_v44 = vsel %vm433_vm9, 1, %v1000_v5  ;;  %vm1814_vm1 = vcmp.gt.f32.partialorder %v1123_v17, 0.0  ;;  %vm1815_vm14 = vcmp.gt.f32.partialorder %v1144_v20, 0.0 }
  0x9e   :  { %255 = vperm.xlu1 %954, %v230_v62   ;;  %v235_v34 = vsel %vm218_vm15, 1, %v1000_v5  ;;  %vm217_vm2 = vmor %vm1812_vm12, %vm201_vm4  ;;  %vm427_vm15 = vcmp.eq.f32.partialorder %v1201_v29, 0.0  ;;  %v1003_v29 = vmov 0.0   ;;  %vm432_vm4 = vcmp.eq.f32.partialorder %v1144_v20, 0.0 }
  0x9f   :  { %288 = vperm.xlu0 %944, %v241_v63   ;;  %v234_v38 = vsel %vm217_vm2, 1, %v1000_v5  ;;  %vm216_vm0 = vmor %vm1813_vm3, %vm200_vm8  ;;  %v1348_v45 = vpop.permute.xlu1 %373  ;;  %v1366_v49 = vsel %vm427_vm15, 1, %v1000_v5  ;;  %900 = vmatprep.subr.mxu0 %v1003_v29  ;;  %v448_v20 = vsel %vm431_vm6, 1, %v1000_v5  ;;  %vm430_vm12 = vcmp.eq.f32.partialorder %v1170_v24, 0.0 }
  0xa0   :  { %v233_v42 = vsel %vm216_vm0, 1, %v1000_v5  ;;  %vm215_vm13 = vmor %vm1814_vm1, %vm199_vm10  ;;  %v447_v52 = vsel %vm430_vm12, 1, %v1000_v5  ;;  %vm429_vm2 = vcmp.eq.f32.partialorder %v1175_v25, 0.0  ;;  %vm428_vm8 = vcmp.eq.f32.partialorder %v1196_v28, 0.0 }
  0xa1   :  { %vm214_vm5 = vmor %vm1815_vm14, %vm198_vm7  ;;  %v232_v46 = vsel %vm215_vm13, 1, %v1000_v5  ;;  %v446_v54 = vsel %vm429_vm2, 1, %v1000_v5  ;;  %v445_v57 = vsel %vm428_vm8, 1, %v1000_v5  ;;  %vm390_vm10 = vcmp.eq.s32.totalorder %v1348_v45, 1 }
  0xa2   :  { %282 = vperm.xlu1 %954, %v239_v7   ;;  %v410_v7 = vsel %vm390_vm10, %v1464_v61, 0.0 }
  0xa3   :  { %285 = vperm.xlu0 %944, %v240_v10   ;;  %v1355_v47 = vpop.permute.xlu1 %370 }
  0xa4   :  { %vm389_vm9 = vcmp.eq.s32.totalorder %v1355_v47, 1 }
  0xa6   :  { %279 = vperm.xlu1 %954, %v238_v11   ;;  %v409_v11 = vsel %vm389_vm9, %v1464_v61, 0.0 }
  0xa7   :  { %276 = vperm.xlu0 %944, %v237_v14   ;;  %v1360_v48 = vpop.permute.xlu1 %503 }
  0xa8   :  { %vm522_vm1 = vcmp.eq.s32.totalorder %v1360_v48, 1 }
  0xaa   :  { %273 = vperm.xlu1 %954, %v236_v15  }
  0xab   :  { %270 = vperm.xlu0 %944, %v235_v34   ;;  %v1369_v50 = vpop.permute.xlu1 %364 }
  0xac   :  { %vm387_vm14 = vcmp.eq.s32.totalorder %v1369_v50, 1 }
  0xae   :  { %267 = vperm.xlu1 %954, %v234_v38   ;;  %v407_v38 = vsel %vm387_vm14, %v1464_v61, 0.0  ;;  %vm1004_vm14 = vmmov 0  }
  0xaf   :  { %485 = vperm.xlu0 %944, %v452_v36   ;;  %932 = vmatprep.mubr.msk.f32.mxu0 %vm1004_vm14, %v1003_v29 }
  0xb2   :  { %349 = vperm.xlu1 %954, %v1158_v22  }
  0xb3   :  { %264 = vperm.xlu0 %944, %v233_v42   ;;  %v1494_v42 = vld [vmem:[%s1796_s2 + $0x2] ss:$0 sm:$0xff] }
  0xb6   :  { %955 = vset.pattern.permute.xlu1 %v1002_v39 }
  0xb7   :  { %482 = vperm.xlu0 %944, %v451_v43   ;;  %589 = vperm.xlu1 %955, %v1132_v18   ;;  %v231_v18 = vsel %vm214_vm5, 1, %v1000_v5 }
  0xbb   :  { %479 = vperm.xlu0 %944, %v450_v44   ;;  %956 = vset.pattern.permute.xlu1 %v999_v4 }
  0xbc   :  { %261 = vperm.xlu1 %956, %v232_v46  }
  0xbf   :  { %258 = vperm.xlu0 %944, %v231_v18  }
  0xc0   :  { %346 = vperm.xlu1 %956, %v1163_v23  }
  0xc3   :  { %337 = vperm.xlu0 %944, %v1210_v30  }
  0xc4   :  { %957 = vset.pattern.permute.xlu1 %v1002_v39 }
  0xc5   :  { %586 = vperm.xlu1 %957, %v1137_v19   ;;  %v1375_v19 = vpop.permute.xlu1 %604 }
  0xc6   :  { %vm623_vm12 = vcmp.eq.s32.totalorder %v1375_v19, 1 }
  0xc7   :  { %331 = vperm.xlu0 %944, %v1226_v32   ;;  %v643_v19 = vsel %vm623_vm12, %v1494_v42, 0.0 }
  0xc9   :  { %690 = vperm.xlu1 %957, %v1266_v41   ;;  %v1382_v41 = vpop.permute.xlu1 %708 }
  0xcb   :  { %461 = vperm.xlu0 %944, %v1366_v49  }
  0xcd   :  { %958 = vset.pattern.permute.xlu1 %v999_v4  ;;  %v1389_v51 = vpop.permute.xlu1 %361 }
  0xce   :  { %343 = vperm.xlu1 %958, %v1184_v26   ;;  %vm386_vm2 = vcmp.eq.s32.totalorder %v1389_v51, 1 }
  0xcf   :  { %970 = vset.pattern.permute.xlu0 %v1002_v39 }
  0xd0   :  { %607 = vperm.xlu0 %970, %v1055_v6   ;;  %v449_v6 = vsel %vm432_vm4, 1, %v1000_v5 }
  0xd2   :  { %959 = vset.pattern.permute.xlu1 %v1002_v39 }
  0xd3   :  { %583 = vperm.xlu1 %959, %v1158_v22   ;;  %v1392_v22 = vpop.permute.xlu1 %601 }
  0xd4   :  { %705 = vperm.xlu0 %970, %v1245_v35   ;;  %vm622_vm8 = vcmp.eq.s32.totalorder %v1392_v22, 1  ;;  %v406_v22 = vsel %vm386_vm2, %v1464_v61, 0.0 }
  0xd7   :  { %960 = vset.pattern.permute.xlu1 %v999_v4  ;;  %v1399_v35 = vpop.permute.xlu1 %358 }
  0xd8   :  { %699 = vperm.xlu0 %970, %v1251_v37   ;;  %340 = vperm.xlu1 %960, %v1189_v27   ;;  %v1401_v37 = vpop.permute.xlu0 %506  ;;  %vm385_vm9 = vcmp.eq.s32.totalorder %v1399_v35, 1 }
  0xd9   :  { %vm523_vm7 = vcmp.eq.s32.totalorder %v1401_v37, 1 }
  0xdc   :  { %693 = vperm.xlu0 %970, %v1261_v40   ;;  %476 = vperm.xlu1 %960, %v449_v6   ;;  %v1405_v40 = vpop.permute.xlu1 %598  ;;  %v1409_v21 = vpop.permute.xlu0 %367 }
  0xdd   :  { %vm388_vm13 = vcmp.eq.s32.totalorder %v1409_v21, 1 }
  0xde   :  { %v408_v34 = vsel %vm388_vm13, %v1464_v61, 0.0 }
  0xe0   :  { %687 = vperm.xlu0 %970, %v452_v36   ;;  %961 = vset.pattern.permute.xlu1 %v1002_v39 }
  0xe1   :  { %684 = vperm.xlu1 %961, %v451_v43  }
  0xe4   :  { %580 = vperm.xlu0 %970, %v1163_v23   ;;  %v1413_v23 = vpop.permute.xlu1 %702 }
  0xe5   :  { %962 = vset.pattern.permute.xlu1 %v999_v4  ;;  %vm723_vm10 = vcmp.eq.s32.totalorder %v1413_v23, 1 }
  0xe6   :  { %473 = vperm.xlu1 %962, %v448_v20  }
  0xe8   :  { %681 = vperm.xlu0 %970, %v450_v44   ;;  %v1419_v53 = vpop.permute.xlu1 %355 }
  0xea   :  { %963 = vset.pattern.permute.xlu1 %v1002_v39 }
  0xeb   :  { %577 = vperm.xlu1 %963, %v1184_v26   ;;  %v1417_v26 = vpop.permute.xlu0 %500 }
  0xec   :  { %574 = vperm.xlu0 %970, %v1189_v27   ;;  %v1426_v27 = vpop.permute.xlu1 %595  ;;  %vm521_vm5 = vcmp.eq.s32.totalorder %v1417_v26, 1 }
  0xef   :  { %964 = vset.pattern.permute.xlu1 %v999_v4  ;;  %v1424_v24 = vpop.permute.xlu0 %497 }
  0xf0   :  { %675 = vperm.xlu0 %970, %v448_v20   ;;  %334 = vperm.xlu1 %964, %v1215_v31   ;;  %v1430_v55 = vpop.permute.xlu1 %352  ;;  %vm520_vm15 = vcmp.eq.s32.totalorder %v1424_v24, 1  ;;  %v642_v20 = vsel %vm622_vm8, %v1494_v42, 0.0  ;;  %v1517_v24 = vld [vmem:[%s1796_s2 + $0x4] ss:$0 sm:$0xff] }
  0xf4   :  { %568 = vperm.xlu0 %970, %v1215_v31   ;;  %470 = vperm.xlu1 %964, %v447_v52   ;;  %v495_v31 = vpop.permute.xlu0 %494  ;;  %v1437_v25 = vpop.permute.xlu1 %592 }
  0xf5   :  { %vm519_vm6 = vcmp.eq.s32.totalorder %v495_v31, 1  ;;  %v743_v31 = vsel %vm723_vm10, %v1517_v24, 0.0  ;;  %vm619_vm12 = vcmp.eq.s32.totalorder %v1437_v25, 1 }
  0xf8   :  { %562 = vperm.xlu0 %970, %v1231_v33   ;;  %965 = vset.pattern.permute.xlu1 %v1002_v39  ;;  %v1434_v56 = vpop.permute.xlu0 %491  ;;  %v1444_v59 = vpop.permute.xlu1 %696 }
  0xf9   :  { %678 = vperm.xlu1 %965, %v449_v6  }
  0xfc   :  { %v1442_v58 = vpop.permute.xlu0 %488 }
  0xfd   :  { %966 = vset.pattern.permute.xlu1 %v999_v4  ;;  %vm517_vm10 = vcmp.eq.s32.totalorder %v1442_v58, 1 }
  0xfe   :  { %467 = vperm.xlu1 %966, %v446_v54  }
 0x102   :  { %967 = vset.pattern.permute.xlu1 %v1002_v39 }
 0x103   :  { %571 = vperm.xlu1 %967, %v1210_v30   ;;  %v1450_v30 = vld [vmem:[%s1796_s2] ss:$0 sm:$0xff] }
 0x107   :  { %968 = vset.pattern.permute.xlu1 %v999_v4 }
 0x108   :  { %328 = vperm.xlu1 %968, %v1231_v33  }
 0x10c   :  { %464 = vperm.xlu1 %968, %v445_v57  }
 0x110   :  { %969 = vset.pattern.permute.xlu1 %v1002_v39 }
 0x111   :  { %672 = vperm.xlu1 %969, %v447_v52   ;;  %v247_v28 = vpop.permute.xlu1 %246 }
 0x112   :  { %v244_v60 = vpop.permute.xlu0 %243  ;;  %vm291_vm3 = vcmp.eq.s32.totalorder %v247_v28, 1 }
 0x113   :  { %vm290_vm0 = vcmp.eq.s32.totalorder %v244_v60, 1  ;;  %v1453_v4 = vsel %vm291_vm3, %v1450_v30, 0.0 }
 0x114   :  { %v1456_v5 = vsel %vm290_vm0, %v1450_v30, 0.0 }
 0x115   :  { %565 = vperm.xlu1 %969, %v1226_v32   ;;  %v250_v33 = vpop.permute.xlu1 %249  ;;  %v1475_v32 = vld [vmem:[%s1796_s2 + $0x3] ss:$0 sm:$0xff] }
 0x116   :  { %v1459_v39 = vpop.permute.xlu0 %252  ;;  %vm292_vm11 = vcmp.eq.s32.totalorder %v250_v33, 1  ;;  %v543_v14 = vsel %vm523_vm7, %v1475_v32, 0.0  ;;  %v542_v15 = vsel %vm522_vm1, %v1475_v32, 0.0  ;;  %v541_v43 = vsel %vm521_vm5, %v1475_v32, 0.0 }
 0x117   :  { %v1468_v62 = vsel %vm292_vm11, %v1450_v30, 0.0  ;;  %v540_v46 = vsel %vm520_vm15, %v1475_v32, 0.0  ;;  %v539_v47 = vsel %vm519_vm6, %v1475_v32, 0.0  ;;  %vm518_vm11 = vcmp.eq.s32.totalorder %v1434_v56, 1 }
 0x118   :  { %vm621_vm7 = vcmp.eq.s32.totalorder %v1405_v40, 1  ;;  %vm620_vm5 = vcmp.eq.s32.totalorder %v1426_v27, 1  ;;  %vm63_vm15 = vcmask 237568   ;;  %vm721_vm6 = vcmp.eq.s32.totalorder %v1444_v59, 1 }
 0x119   :  { %669 = vperm.xlu1 %969, %v446_v54   ;;  %v1479_v63 = vpop.permute.xlu1 %255  ;;  %64 = vst.msk [vmem:[#allocation2] sm:$0x1] %vm63_vm15, %v1003_v29  ;;  %v641_v27 = vsel %vm621_vm7, %v1494_v42, 0.0  ;;  %v640_v35 = vsel %vm620_vm5, %v1494_v42, 0.0  ;;  %v741_v40 = vsel %vm721_vm6, %v1517_v24, 0.0  ;;  %vm293_vm2 = vcmp.eq.s32.totalorder %v1459_v39, 1 }
 0x11a   :  { %v289_v10 = vpop.permute.xlu0 %288  ;;  %v78_v39 = vld [vmem:[%s1794_s0 + $0x68] sm:$0xff]  ;;  %v537_v58 = vsel %vm517_vm10, %v1475_v32, 0.0 }
 0x11b   :  { %vm305_vm4 = vcmp.eq.s32.totalorder %v289_v10, 1  ;;  %v405_v10 = vsel %vm385_vm9, %v1464_v61, 0.0  ;;  %vm384_vm9 = vcmp.eq.s32.totalorder %v1419_v53, 1 }
 0x11c   :  { %v325_v36 = vsel %vm305_vm4, %v1450_v30, 0.0 }
 0x11d   :  { %v426_v44 = vadd.f32 %v410_v7, %v325_v36  ;;  %666 = vperm.xlu1 %969, %v445_v57   ;;  %v283_v45 = vpop.permute.xlu1 %282 }
 0x11e   :  { %v286_v18 = vpop.permute.xlu0 %285  ;;  %vm303_vm3 = vcmp.eq.s32.totalorder %v283_v45, 1 }
 0x11f   :  { %vm304_vm0 = vcmp.eq.s32.totalorder %v286_v18, 1  ;;  %v323_v48 = vsel %vm303_vm3, %v1450_v30, 0.0  ;;  %v1503_v50 = vadd.f32 %v543_v14, %v426_v44  ;;  %v538_v44 = vsel %vm518_vm11, %v1475_v32, 0.0 }
 0x120   :  { %v324_v6 = vsel %vm304_vm0, %v1450_v30, 0.0  ;;  %v424_v51 = vadd.f32 %v408_v34, %v323_v48  ;;  %vm725_vm11 = vcmp.eq.s32.totalorder %v1382_v41, 1 }
 0x121   :  { %v425_v37 = vadd.f32 %v409_v11, %v324_v6  ;;  %663 = vperm.xlu1 %969, %v1366_v49   ;;  %v280_v21 = vpop.permute.xlu1 %279  ;;  %v745_v41 = vsel %vm725_vm11, %v1517_v24, 0.0 }
 0x122   :  { %v557_v52 = vadd.f32 %v541_v43, %v424_v51  ;;  %v277_v26 = vpop.permute.xlu0 %276  ;;  %vm302_vm1 = vcmp.eq.s32.totalorder %v280_v21, 1 }
 0x123   :  { %v558_v54 = vadd.f32 %v542_v15, %v425_v37  ;;  %vm301_vm13 = vcmp.eq.s32.totalorder %v277_v26, 1  ;;  %v322_v23 = vsel %vm302_vm1, %v1450_v30, 0.0  ;;  %v313_v26 = vsel %vm293_vm2, %v1450_v30, 0.0 }
 0x124   :  { %v658_v49 = vadd.f32 %v642_v20, %v557_v52  ;;  %v321_v57 = vsel %vm301_vm13, %v1450_v30, 0.0  ;;  %v423_v28 = vadd.f32 %v407_v38, %v322_v23  ;;  %vm383_vm1 = vcmp.eq.s32.totalorder %v1430_v55, 1 }
 0x125   :  { %v422_v60 = vadd.f32 %v406_v22, %v321_v57  ;;  %v274_v33 = vpop.permute.xlu1 %273  ;;  %v1524_v7 = vadd.f32 %v643_v19, %v558_v54 }
 0x126   :  { %v556_v11 = vadd.f32 %v540_v46, %v423_v28  ;;  %v1529_v14 = vpop.permute.xlu0 %270  ;;  %vm300_vm4 = vcmp.eq.s32.totalorder %v274_v33, 1  ;;  %v1531_v15 = vadd.f32 %v743_v31, %v658_v49  ;;  %v76_v33 = vld [vmem:[%s1794_s0 + $0x58] sm:$0xff] }
 0x127   :  { %v555_v34 = vadd.f32 %v539_v47, %v422_v60  ;;  %v320_v36 = vsel %vm300_vm4, %v1450_v30, 0.0  ;;  %v639_v47 = vsel %vm619_vm12, %v1494_v42, 0.0  ;;  %vm299_vm0 = vcmp.eq.s32.totalorder %v1529_v14, 1 }
 0x128   :  { %v421_v38 = vadd.f32 %v405_v10, %v320_v36  ;;  %v1542_v43 = vadd.f32 %v641_v27, %v556_v11  ;;  %v74_v11 = vld [vmem:[%s1794_s0 + $0x48] sm:$0xff]  ;;  %v80_v27 = vld [vmem:[%s1794_s0 + $0x78] sm:$0xff]  ;;  %v77_v36 = vld [vmem:[%s1794_s0 + $0x60] sm:$0xff] }
 0x129   :  { %v656_v45 = vadd.f32 %v640_v35, %v555_v34  ;;  %v1547_v46 = vpop.permute.xlu1 %267  ;;  %v110_v34 = vsub.f32 %v78_v39, %v1035_v1  ;;  %v108_v35 = vsub.f32 %v76_v33, %v1066_v8  ;;  %v106_v1 = vsub.f32 %v74_v11, %v1092_v12 }
 0x12a   :  { %v554_v59 = vadd.f32 %v538_v44, %v421_v38  ;;  %v1550_v18 = vpop.permute.xlu0 %485  ;;  %v75_v44 = vld [vmem:[%s1794_s0 + $0x50] sm:$0xff]  ;;  %vm298_vm13 = vcmp.eq.s32.totalorder %v1547_v46, 1 }
 0x12b   :  { %v1553_v48 = vadd.f32 %v741_v40, %v656_v45  ;;  %v112_v45 = vsub.f32 %v80_v27, %v1030_v0  ;;  %v126_v14 = vmul.f32 %v110_v34, %v110_v34  ;;  %v107_v12 = vsub.f32 %v75_v44, %v1071_v9 }
 0x12c   :  { %v1555_v25 = vadd.f32 %v639_v47, %v554_v59  ;;  %v109_v59 = vsub.f32 %v77_v36, %v1048_v3  ;;  %v319_v47 = vsel %vm299_vm0, %v1450_v30, 0.0  ;;  %v404_v3 = vsel %vm384_vm9, %v1464_v61, 0.0 }
 0x12d   :  { %v1557_v19 = vpop.permute.xlu1 %349  ;;  %v128_v9 = vmul.f32 %v112_v45, %v112_v45  ;;  %v1638_v34 = vmul.f32 %v107_v12, %v107_v12  ;;  %vm516_vm5 = vcmp.eq.s32.totalorder %v1550_v18, 1 }
 0x12e   :  { %v1559_v6 = vpop.permute.xlu0 %264  ;;  %v125_v11 = vmul.f32 %v109_v59, %v109_v59  ;;  %vm382_vm12 = vcmp.eq.s32.totalorder %v1557_v19, 1 }
 0x12f   :  { %vm297_vm6 = vcmp.eq.s32.totalorder %v1559_v6, 1 }
 0x132   :  { %v1561_v56 = vpop.permute.xlu0 %482  ;;  %v1563_v51 = vpop.permute.xlu1 %589 }
 0x133   :  { %vm618_vm4 = vcmp.eq.s32.totalorder %v1563_v51, 1  ;;  %vm515_vm2 = vcmp.eq.s32.totalorder %v1561_v56, 1  ;;  %v402_v56 = vsel %vm382_vm12, %v1464_v61, 0.0 }
 0x134   :  { %v638_v59 = vsel %vm618_vm4, %v1494_v42, 0.0  ;;  %v535_v51 = vsel %vm515_vm2, %v1475_v32, 0.0  ;;  %vm294_vm2 = vcmp.eq.s32.totalorder %v1479_v63, 1 }
 0x136   :  { %v1565_v22 = vpop.permute.xlu0 %479 }
 0x137   :  { %v1567_v20 = vpop.permute.xlu1 %261 }
 0x13a   :  { %v1569_v37 = vpop.permute.xlu0 %258 }
 0x13b   :  { %v1571_v21 = vpop.permute.xlu1 %346 }
 0x13c   :  { %vm381_vm10 = vcmp.eq.s32.totalorder %v1571_v21, 1 }
 0x13e   :  { %v338_v52 = vpop.permute.xlu0 %337 }
 0x13f   :  { %vm378_vm8 = vcmp.eq.s32.totalorder %v338_v52, 1  ;;  %v124_v52 = vmul.f32 %v108_v35, %v108_v35  ;;  %v318_v35 = vsel %vm298_vm13, %v1450_v30, 0.0 }
 0x140   :  { %v398_v54 = vsel %vm378_vm8, %v1464_v61, 0.0  ;;  %v1576_v23 = vpop.permute.xlu1 %586 }
 0x141   :  { %v1578_v31 = vadd.f32 %v398_v54, %v313_v26  ;;  %v1626_v26 = vmul.f32 %v106_v1, %v106_v1  ;;  %vm617_vm0 = vcmp.eq.s32.totalorder %v1576_v23, 1  ;;  %v773_v6 = vmul.f32 %v1553_v48, %v124_v52 }
 0x142   :  { %v332_v49 = vpop.permute.xlu0 %331 }
 0x143   :  { %vm376_vm3 = vcmp.eq.s32.totalorder %v332_v49, 1  ;;  %v72_v49 = vld [vmem:[%s1794_s0 + $0x38] sm:$0xff] }
 0x144   :  { %v396_v57 = vsel %vm376_vm3, %v1464_v61, 0.0  ;;  %v1581_v28 = vpop.permute.xlu1 %690  ;;  %v104_v36 = vsub.f32 %v72_v49, %v1118_v16 }
 0x145   :  { %v1587_v60 = vadd.f32 %v396_v57, %v1453_v4  ;;  %v79_v4 = vld [vmem:[%s1794_s0 + $0x70] sm:$0xff]  ;;  %v420_v57 = vadd.f32 %v404_v3, %v319_v47  ;;  %vm719_vm8 = vcmp.eq.s32.totalorder %v1581_v28, 1 }
 0x146   :  { %v1592_v10 = vpop.permute.xlu0 %461  ;;  %v111_v8 = vsub.f32 %v79_v4, %v1040_v2  ;;  %v73_v2 = vld [vmem:[%s1794_s0 + $0x40] sm:$0xff]  ;;  %v739_v28 = vsel %vm719_vm8, %v1517_v24, 0.0  ;;  %v120_v49 = vmul.f32 %v104_v36, %v104_v36  ;;  %vm295_vm8 = vcmp.eq.s32.totalorder %v1569_v37, 1 }
 0x147   :  { %v105_v55 = vsub.f32 %v73_v2, %v1097_v13  ;;  %v553_v13 = vadd.f32 %v537_v58, %v420_v57  ;;  %v315_v63 = vsel %vm295_vm8, %v1450_v30, 0.0 }
 0x148   :  { %v127_v33 = vmul.f32 %v111_v8, %v111_v8 }
 0x149   :  { %v1609_v38 = vpop.permute.xlu1 %343  ;;  %v121_v23 = vmul.f32 %v105_v55, %v105_v55 }
 0x14b   :  { %v608_v40 = vpop.permute.xlu0 %607 }
 0x14c   :  { %vm624_vm7 = vcmp.eq.s32.totalorder %v608_v40, 1  ;;  %v775_v40 = vmul.f32 %v1531_v15, %v126_v14  ;;  %v317_v15 = vsel %vm297_vm6, %v1450_v30, 0.0  ;;  %vm380_vm6 = vcmp.eq.s32.totalorder %v1609_v38, 1  ;;  %v70_v38 = vld [vmem:[%s1794_s0 + $0x28] sm:$0xff] }
 0x14d   :  { %v644_v0 = vsel %vm624_vm7, %v1494_v42, 0.0  ;;  %vm296_vm7 = vcmp.eq.s32.totalorder %v1567_v20, 1 }
 0x14e   :  { %v660_v53 = vadd.f32 %v644_v0, %v1503_v50  ;;  %v584_v54 = vpop.permute.xlu1 %583  ;;  %v403_v50 = vsel %vm383_vm1, %v1464_v61, 0.0  ;;  %v637_v0 = vsel %vm617_vm0, %v1494_v42, 0.0  ;;  %vm514_vm1 = vcmp.eq.s32.totalorder %v1565_v22, 1 }
 0x14f   :  { %v706_v39 = vpop.permute.xlu0 %705  ;;  %v419_v8 = vadd.f32 %v403_v50, %v318_v35  ;;  %vm616_vm11 = vcmp.eq.s32.totalorder %v584_v54, 1 }
 0x150   :  { %vm724_vm14 = vcmp.eq.s32.totalorder %v706_v39, 1  ;;  %v761_v27 = vadd.f32 %v745_v41, %v660_v53  ;;  %v654_v41 = vadd.f32 %v638_v59, %v553_v13  ;;  %v636_v48 = vsel %vm616_vm11, %v1494_v42, 0.0 }
 0x151   :  { %v744_v4 = vsel %vm724_vm14, %v1517_v24, 0.0  ;;  %v401_v53 = vsel %vm381_vm10, %v1464_v61, 0.0 }
 0x152   :  { %v760_v46 = vadd.f32 %v744_v4, %v1524_v7  ;;  %v777_v44 = vmul.f32 %v761_v27, %v128_v9  ;;  %v536_v7 = vsel %vm516_vm5, %v1475_v32, 0.0  ;;  %v755_v3 = vadd.f32 %v739_v28, %v654_v41  ;;  %v71_v27 = vld [vmem:[%s1794_s0 + $0x30] sm:$0xff] }
 0x153   :  { %v700_v1 = vpop.permute.xlu0 %699  ;;  %v1650_v45 = vpop.permute.xlu1 %340  ;;  %v552_v58 = vadd.f32 %v536_v7, %v419_v8 }
 0x154   :  { %vm722_vm3 = vcmp.eq.s32.totalorder %v700_v1, 1  ;;  %901 = vmatpush3.msra.mxu0 %v777_v44  ;;  %v776_v16 = vmul.f32 %v760_v46, %v127_v33  ;;  %v103_v46 = vsub.f32 %v71_v27, %v1123_v17  ;;  %v534_v44 = vsel %vm514_vm1, %v1475_v32, 0.0 }
 0x155   :  { %v742_v47 = vsel %vm722_vm3, %v1517_v24, 0.0  ;;  %902 = vmatprep.subr.mxu0 %v1003_v29  ;;  %v653_v57 = vadd.f32 %v637_v0, %v552_v58  ;;  %vm379_vm12 = vcmp.eq.s32.totalorder %v1650_v45, 1  ;;  %vm508_vm1 = vcmp.eq.s32.totalorder %v1592_v10, 1  ;;  %v973_v10 = vld [vmem:[%s1795_s1 + $0x18] sm:$0xff] }
 0x156   :  { %v758_v18 = vadd.f32 %v742_v47, %v1542_v43  ;;  %903 = vmatpush3.msra.mxu0 %v776_v16  ;;  %v418_v43 = vadd.f32 %v402_v56, %v317_v15  ;;  %v119_v8 = vmul.f32 %v103_v46, %v103_v46 }
 0x157   :  { %v694_v14 = vpop.permute.xlu0 %693  ;;  %904 = vmatprep.subr.mxu0 %v1003_v29  ;;  %v1674_v12 = vpop.permute.xlu1 %476 }
 0x158   :  { %vm720_vm9 = vcmp.eq.s32.totalorder %v694_v14, 1  ;;  %905 = vmatpush3.msra.mxu0 %v775_v40  ;;  %v774_v19 = vmul.f32 %v758_v18, %v125_v11  ;;  %v551_v52 = vadd.f32 %v535_v51, %v418_v43  ;;  %vm513_vm3 = vcmp.eq.s32.totalorder %v1674_v12, 1  ;;  %v971_v43 = vld [vmem:[%s1795_s1 + $0x28] sm:$0xff] }
 0x159   :  { %v740_v2 = vsel %vm720_vm9, %v1517_v24, 0.0  ;;  %906 = vmatprep.subr.mxu0 %v1003_v29  ;;  %v400_v18 = vsel %vm380_vm6, %v1464_v61, 0.0  ;;  %v399_v51 = vsel %vm379_vm12, %v1464_v61, 0.0  ;;  %v314_v14 = vsel %vm294_vm2, %v1450_v30, 0.0 }
 0x15a   :  { %v756_v21 = vadd.f32 %v740_v2, %v1555_v25  ;;  %907 = vmatpush3.msra.mxu0 %v774_v19  ;;  %v316_v25 = vsel %vm296_vm7, %v1450_v30, 0.0  ;;  %v652_v33 = vadd.f32 %v636_v48, %v551_v52  ;;  %v533_v37 = vsel %vm513_vm3, %v1475_v32, 0.0  ;;  %v972_v48 = vld [vmem:[%s1795_s1 + $0x20] sm:$0xff] }
 0x15b   :  { %v688_v9 = vpop.permute.xlu0 %687  ;;  %908 = vmatprep.subr.mxu0 %v1003_v29  ;;  %v417_v55 = vadd.f32 %v401_v53, %v316_v25  ;;  %v416_v41 = vadd.f32 %v400_v18, %v315_v63  ;;  %v415_v19 = vadd.f32 %v399_v51, %v314_v14  ;;  %v102_v58 = vsub.f32 %v70_v38, %v971_v43  ;;  %v975_v14 = vld [vmem:[%s1795_s1 + $0x8] sm:$0xff] }
 0x15c   :  { %vm718_vm13 = vcmp.eq.s32.totalorder %v688_v9, 1  ;;  %909 = vmatpush3.msra.mxu0 %v773_v6  ;;  %v685_v39 = vpop.permute.xlu1 %684  ;;  %v772_v54 = vmul.f32 %v756_v21, %v1638_v34  ;;  %v771_v34 = vmul.f32 %v755_v3, %v1626_v26  ;;  %v69_v6 = vld [vmem:[%s1794_s0 + $0x20] sm:$0xff] }
 0x15d   :  { %v738_v11 = vsel %vm718_vm13, %v1517_v24, 0.0  ;;  %vm717_vm14 = vcmp.eq.s32.totalorder %v685_v39, 1  ;;  %910 = vmatprep.subr.mxu0 %v1003_v29  ;;  %v550_v26 = vadd.f32 %v534_v44, %v417_v55  ;;  %v549_v2 = vadd.f32 %v533_v37, %v416_v41 }
 0x15e   :  { %v754_v50 = vadd.f32 %v738_v11, %v653_v57  ;;  %v737_v4 = vsel %vm717_vm14, %v1517_v24, 0.0  ;;  %911 = vmatpush3.msra.mxu0 %v772_v54  ;;  %v101_v21 = vsub.f32 %v69_v6, %v972_v48  ;;  %v65_v6 = vld [vmem:[%s1794_s0] sm:$0xff] }
 0x15f   :  { %v753_v36 = vadd.f32 %v737_v4, %v652_v33  ;;  %v581_v20 = vpop.permute.xlu0 %580  ;;  %912 = vmatprep.subr.mxu0 %v1003_v29 }
 0x160   :  { %vm615_vm5 = vcmp.eq.s32.totalorder %v581_v20, 1  ;;  %913 = vmatpush3.msra.mxu0 %v771_v34  ;;  %v770_v35 = vmul.f32 %v754_v50, %v121_v23  ;;  %v117_v25 = vmul.f32 %v101_v21, %v101_v21  ;;  %v528_v20 = vsel %vm508_vm1, %v1475_v32, 0.0 }
 0x161   :  { %v635_v13 = vsel %vm615_vm5, %v1494_v42, 0.0  ;;  %914 = vmatprep.subr.mxu0 %v1003_v29  ;;  %v474_v1 = vpop.permute.xlu1 %473  ;;  %v769_v40 = vmul.f32 %v753_v36, %v120_v49  ;;  %v118_v49 = vmul.f32 %v102_v58, %v102_v58  ;;  %v68_v36 = vld [vmem:[%s1794_s0 + $0x18] sm:$0xff] }
 0x162   :  { %915 = vmatpush3.msra.mxu0 %v770_v35  ;;  %v651_v7 = vadd.f32 %v635_v13, %v550_v26  ;;  %vm512_vm0 = vcmp.eq.s32.totalorder %v474_v1, 1  ;;  %v100_v13 = vsub.f32 %v68_v36, %v973_v10 }
 0x163   :  { %v682_v16 = vpop.permute.xlu0 %681  ;;  %916 = vmatprep.subr.mxu0 %v1003_v29  ;;  %v532_v12 = vsel %vm512_vm0, %v1475_v32, 0.0 }
 0x164   :  { %vm716_vm4 = vcmp.eq.s32.totalorder %v682_v16, 1  ;;  %917 = vmatpush3.msra.mxu0 %v769_v40  ;;  %v548_v3 = vadd.f32 %v532_v12, %v415_v19 }
 0x165   :  { %v736_v17 = vsel %vm716_vm4, %v1517_v24, 0.0  ;;  %918 = vmatprep.subr.mxu0 %v1003_v29 }
 0x166   :  { %v752_v22 = vadd.f32 %v736_v17, %v651_v7  ;;  %v578_v59 = vpop.permute.xlu1 %577  ;;  %v116_v7 = vmul.f32 %v100_v13, %v100_v13 }
 0x167   :  { %v575_v47 = vpop.permute.xlu0 %574  ;;  %vm614_vm10 = vcmp.eq.s32.totalorder %v578_v59, 1 }
 0x168   :  { %v768_v15 = vmul.f32 %v752_v22, %v119_v8  ;;  %vm613_vm11 = vcmp.eq.s32.totalorder %v575_v47, 1  ;;  %v634_v30 = vsel %vm614_vm10, %v1494_v42, 0.0  ;;  %v67_v8 = vld [vmem:[%s1794_s0 + $0x10] sm:$0xff] }
 0x169   :  { %v633_v0 = vsel %vm613_vm11, %v1494_v42, 0.0  ;;  %v650_v23 = vadd.f32 %v634_v30, %v549_v2  ;;  %v976_v30 = vld [vmem:[%s1795_s1] sm:$0xff] }
 0x16a   :  { %919 = vmatpush3.msra.mxu0 %v768_v15  ;;  %v649_v9 = vadd.f32 %v633_v0, %v548_v3  ;;  %v97_v2 = vsub.f32 %v65_v6, %v976_v30 }
 0x16b   :  { %v1713_v56 = vpop.permute.xlu1 %334  ;;  %920 = vmatprep.subr.mxu0 %v1003_v29  ;;  %v676_v28 = vpop.permute.xlu0 %675 }
 0x16c   :  { %vm714_vm9 = vcmp.eq.s32.totalorder %v676_v28, 1  ;;  %vm377_vm4 = vcmp.eq.s32.totalorder %v1713_v56, 1  ;;  %v66_v28 = vld [vmem:[%s1794_s0 + $0x8] sm:$0xff]  ;;  %s1006_s0 = smov [#allocation2]  }
 0x16d   :  { %v734_v52 = vsel %vm714_vm9, %v1517_v24, 0.0  ;;  %v397_v40 = vsel %vm377_vm4, %v1464_v61, 0.0  ;;  %v98_v63 = vsub.f32 %v66_v28, %v975_v14 }
 0x16e   :  { %v750_v39 = vadd.f32 %v734_v52, %v649_v9  ;;  %v413_v59 = vadd.f32 %v397_v40, %v1468_v62 }
 0x16f   :  { %v471_v45 = vpop.permute.xlu1 %470  ;;  %v569_v15 = vpop.permute.xlu0 %568  ;;  %v114_v3 = vmul.f32 %v98_v63, %v98_v63 }
 0x170   :  { %v766_v27 = vmul.f32 %v750_v39, %v117_v25  ;;  %vm511_vm14 = vcmp.eq.s32.totalorder %v471_v45, 1  ;;  %vm611_vm2 = vcmp.eq.s32.totalorder %v569_v15, 1 }
 0x171   :  { %v531_v46 = vsel %vm511_vm14, %v1475_v32, 0.0  ;;  %v631_v62 = vsel %vm611_vm2, %v1494_v42, 0.0 }
 0x172   :  { %v547_v1 = vadd.f32 %v531_v46, %v1578_v31 }
 0x173   :  { %v563_v41 = vpop.permute.xlu0 %562 }
 0x174   :  { %v679_v53 = vpop.permute.xlu1 %678  ;;  %vm609_vm11 = vcmp.eq.s32.totalorder %v563_v41, 1 }
 0x175   :  { %vm715_vm7 = vcmp.eq.s32.totalorder %v679_v53, 1  ;;  %v629_v9 = vsel %vm609_vm11, %v1494_v42, 0.0 }
 0x176   :  { %v735_v57 = vsel %vm715_vm7, %v1517_v24, 0.0 }
 0x177   :  { %v751_v54 = vadd.f32 %v735_v57, %v650_v23 }
 0x179   :  { %v468_v33 = vpop.permute.xlu1 %467  ;;  %v767_v11 = vmul.f32 %v751_v54, %v118_v49  ;;  %v113_v49 = vmul.f32 %v97_v2, %v97_v2 }
 0x17a   :  { %vm510_vm6 = vcmp.eq.s32.totalorder %v468_v33, 1  ;;  %v1005_v33 = vmov 1.0  }
 0x17b   :  { %921 = vmatpush3.msra.mxu0 %v767_v11  ;;  %v530_v17 = vsel %vm510_vm6, %v1475_v32, 0.0  ;;  %v848_v11 = vld [vmem:[#allocation2] sm:$0x1] }
 0x17c   :  { %922 = vmatprep.subr.mxu0 %v1003_v29  ;;  %v546_v18 = vadd.f32 %v530_v17, %v413_v59 }
 0x17d   :  { %923 = vmatpush3.msra.mxu0 %v766_v27 }
 0x17e   :  { %v572_v55 = vpop.permute.xlu1 %571  ;;  %924 = vmatprep.subr.mxu0 %v1003_v29  ;;  %v647_v37 = vadd.f32 %v631_v62, %v546_v18 }
 0x17f   :  { %vm612_vm5 = vcmp.eq.s32.totalorder %v572_v55, 1 }
 0x183   :  { %v329_v50 = vpop.permute.xlu1 %328 }
 0x184   :  { %vm375_vm13 = vcmp.eq.s32.totalorder %v329_v50, 1 }
 0x185   :  { %v395_v4 = vsel %vm375_vm13, %v1464_v61, 0.0  ;;  %v974_v61 = vld [vmem:[%s1795_s1 + $0x10] sm:$0xff]  ;;  %s858_s1 = sshll.u32 %s1006_s0, 4  ;;  %s859_s1 = int_to_ptr.vmem [resolvable:$true] %s858_s1 }
 0x186   :  { %v411_v34 = vadd.f32 %v395_v4, %v1456_v5  ;;  %v632_v5 = vsel %vm612_vm5, %v1494_v42, 0.0  ;;  %v99_v56 = vsub.f32 %v67_v8, %v974_v61  ;;  %s977_s16 = scalar_lea.vmem %s859_s1, 16  ;;  %s981_s17 = scalar_lea.vmem %s859_s1, 32 }
 0x187   :  { %v465_v35 = vpop.permute.xlu1 %464  ;;  %v648_v16 = vadd.f32 %v632_v5, %v547_v1  ;;  %p978_p0 = scmp.ne.s32.totalorder %s859_s1, %s977_s16  ;;  %p982_p1 = scmp.lt.s32.totalorder %s859_s1, %s859_s1 }
 0x188   :  { %v544_v44 = vadd.f32 %v528_v20, %v411_v34  ;;  %vm509_vm8 = vcmp.eq.s32.totalorder %v465_v35, 1  ;;  %v115_v12 = vmul.f32 %v99_v56, %v99_v56  ;;  %p983_p2 = scmp.lt.s32.totalorder %s981_s17, %s977_s16 }
 0x189   :  { %v529_v38 = vsel %vm509_vm8, %v1475_v32, 0.0 }
 0x18a   :  { %v545_v43 = vadd.f32 %v529_v38, %v1587_v60  ;;  %v645_v60 = vadd.f32 %v629_v9, %v544_v44  ;;  %p984_p3 = por %p983_p2, %p982_p1 }
 0x18c   :  { %v673_v26 = vpop.permute.xlu1 %672  ;;  %p985_p4 = pnand %p984_p3, %p978_p0 }
 0x18d   :  { %vm713_vm12 = vcmp.eq.s32.totalorder %v673_v26, 1 }
 0x18e   :  { %v733_v22 = vsel %vm713_vm12, %v1517_v24, 0.0 }
 0x18f   :  { %v749_v47 = vadd.f32 %v733_v22, %v648_v16 }
 0x190   :  { %v566_v31 = vpop.permute.xlu1 %565 }
 0x191   :  { %v765_v51 = vmul.f32 %v749_v47, %v116_v7  ;;  %vm610_vm3 = vcmp.eq.s32.totalorder %v566_v31, 1 }
 0x192   :  { %v630_v19 = vsel %vm610_vm3, %v1494_v42, 0.0 }
 0x193   :  { %925 = vmatpush3.msra.mxu0 %v765_v51  ;;  %v646_v48 = vadd.f32 %v630_v19, %v545_v43 }
 0x194   :  { %v670_v45 = vpop.permute.xlu1 %669  ;;  %926 = vmatprep.subr.mxu0 %v1003_v29 }
 0x195   :  { %vm712_vm0 = vcmp.eq.s32.totalorder %v670_v45, 1 }
 0x196   :  { %v732_v32 = vsel %vm712_vm0, %v1517_v24, 0.0 }
 0x197   :  { %v748_v58 = vadd.f32 %v732_v32, %v647_v37 }
 0x198   :  { %v667_v0 = vpop.permute.xlu1 %666 }
 0x199   :  { %vm711_vm10 = vcmp.eq.s32.totalorder %v667_v0, 1  ;;  %v764_v21 = vmul.f32 %v748_v58, %v115_v12 }
 0x19a   :  { %v731_v52 = vsel %vm711_vm10, %v1517_v24, 0.0 }
 0x19b   :  { %v747_v53 = vadd.f32 %v731_v52, %v646_v48  ;;  %927 = vmatpush3.msra.mxu0 %v764_v21 }
 0x19c   :  { %v664_v23 = vpop.permute.xlu1 %663  ;;  %928 = vmatprep.subr.mxu0 %v1003_v29 }
 0x19d   :  { %vm710_vm9 = vcmp.eq.s32.totalorder %v664_v23, 1  ;;  %v763_v57 = vmul.f32 %v747_v53, %v114_v3 }
 0x19e   :  { %v730_v39 = vsel %vm710_vm9, %v1517_v24, 0.0 }
 0x19f   :  { %v746_v54 = vadd.f32 %v730_v39, %v645_v60  ;;  %929 = vmatpush3.msra.mxu0 %v763_v57 }
 0x1a0   :  { %930 = vmatprep.subr.mxu0 %v1003_v29 }
 0x1a1   :  { %v762_v25 = vmul.f32 %v746_v54, %v113_v49 }
 0x1a3   :  { %931 = vmatpush3.msra.mxu0 %v762_v25 }
 0x1a4   :  { %933 = vmatmul.mubr.f32.vlgmr.msra.gmra.mxu0 %v1005_v33 }
 0x264   :  { %v844_v42 = vpop.f32.mrf.mxu0 }
 0x265   :  { %v849_v27 = vadd.f32 %v848_v11, %v844_v42 }
 0x266   :  { %v934_v55 = vpop.f32.mrf.mxu0 }
 0x267   :  { %851 = vst.msk [vmem:[#allocation2] sm:$0x1] %vm63_vm15, %v849_v27 }
 0x268   :  { %988 = shalt.err (!%p985_p4)
}
 0x269   :  { %861 = dma.vmem_to_hbm [thread:$0]  %s859_s1, 16, %s1797_s3, [#allocation3]  }
 0x26a   :  { %997 = dma.done.wait [#allocation3], 16  }
 0x26b   :  { %998 = vsyncadd [#allocation3], 4294967280 }
 0x26c   :  { %865 = vsyncpa [#allocation3], 1 }

</bundles_post_ra>
